<compile_context>
chip_gen: v7x
topology: tpu7x:2x2x1
jax: 0.10.0
libtpu: 0.0.40
codegen_flags: <defaults>
</compile_context>

<pallas_src>
import math
import functools

import jax
import jax.numpy as jnp
from jax.experimental import pallas as pl
from jax.experimental.pallas import tpu as pltpu


def mha_kernel(q_ref, k_ref, v_ref, bias_ref,
               wqt_ref, bq_ref, wkt_ref, bk_ref, wvt_ref, bv_ref,
               wot_ref, bo_ref, out_ref, *, h, d_k, scale):
    """One grid step == one block of `bb` batch elements; all heads in-kernel."""
    bb, S, D = q_ref.shape
    f32, bf16 = jnp.float32, jnp.bfloat16

    # Flatten the batch block so each projection is one big MXU matmul.
    xq = q_ref[...].reshape(bb * S, D).astype(bf16)
    xk = k_ref[...].reshape(bb * S, D).astype(bf16)
    xv = v_ref[...].reshape(bb * S, D).astype(bf16)

    # Projections: y = x @ W_T + b   (weights arrive pre-transposed, bf16)
    Q = jnp.dot(xq, wqt_ref[...], preferred_element_type=f32) + bq_ref[...]
    K = jnp.dot(xk, wkt_ref[...], preferred_element_type=f32) + bk_ref[...]
    V = jnp.dot(xv, wvt_ref[...], preferred_element_type=f32) + bv_ref[...]

    Q = (Q * scale).reshape(bb, S, D).astype(bf16)   # fold 1/sqrt(d_k) once
    K = K.reshape(bb, S, D).astype(bf16)
    V = V.reshape(bb, S, D).astype(bf16)

    bias = bias_ref[...]                             # (bb, S, S) additive f32

    heads = []
    for hh in range(h):                              # h is small & static
        sl = slice(hh * d_k, (hh + 1) * d_k)
        qh = Q[:, :, sl]                             # (bb, S, d_k) bf16
        kh = K[:, :, sl]
        vh = V[:, :, sl]

        s = jnp.einsum('bqd,bkd->bqk', qh, kh,
                       preferred_element_type=f32) + bias      # (bb, S, S)

        m = jnp.max(s, axis=-1, keepdims=True)
        e = jnp.exp(s - m)
        p = e * pl.reciprocal(jnp.sum(e, axis=-1, keepdims=True), approx=True)

        heads.append(jnp.einsum('bqk,bkd->bqd', p.astype(bf16), vh,
                                preferred_element_type=f32))   # (bb, S, d_k)

    # Concat heads -> single output projection with full contraction depth D.
    concat = jnp.concatenate(heads, axis=-1).reshape(bb * S, D).astype(bf16)
    out = jnp.dot(concat, wot_ref[...], preferred_element_type=f32) + bo_ref[...]
    out_ref[...] = out.reshape(bb, S, D)


def multi_headed_attention(query, key, value, params, h, mask=None):
    B, S, D = query.shape
    assert D % h == 0
    d_k = D // h
    wq, bq, wk, bk, wv, bv, wo, bo = params

    # Additive mask bias computed once on the host side (0 = keep, -1e9 = mask).
    if mask is None:
        bias = jnp.zeros((B, S, S), jnp.float32)
    else:
        if mask.ndim == 2:
            mask = jnp.broadcast_to(mask[None], (B, S, S))
        bias = jnp.where(mask == 0, jnp.float32(-1e9), jnp.float32(0.0))

    # Pre-transpose + pre-cast weights; biases as (1, D) f32 tiles.
    wt = lambda w: w.T.astype(jnp.bfloat16)
    b2 = lambda b: b.reshape(1, D).astype(jnp.float32)

    # Batch blocking: keep >=2 balanced parallel grid steps when possible
    # (v7x has 2 TensorCores), otherwise one element per step.
    bb = B // 2 if (B >= 2 and B % 2 == 0) else 1
    grid = (B // bb,)

    kernel = functools.partial(mha_kernel, h=h, d_k=d_k,
                               scale=1.0 / math.sqrt(d_k))

    vec_spec = pl.BlockSpec((bb, S, D), lambda b: (b, 0, 0))
    msk_spec = pl.BlockSpec((bb, S, S), lambda b: (b, 0, 0))
    w_spec = pl.BlockSpec((D, D), lambda b: (0, 0))
    bvec_spec = pl.BlockSpec((1, D), lambda b: (0, 0))

    out = pl.pallas_call(
        kernel,
        out_shape=jax.ShapeDtypeStruct((B, S, D), jnp.float32),
        grid_spec=pltpu.PrefetchScalarGridSpec(
            num_scalar_prefetch=0,
            grid=grid,
            in_specs=[vec_spec, vec_spec, vec_spec, msk_spec,
                      w_spec, bvec_spec,   # Wq^T, bq
                      w_spec, bvec_spec,   # Wk^T, bk
                      w_spec, bvec_spec,   # Wv^T, bv
                      w_spec, bvec_spec],  # Wo^T, bo
            out_specs=vec_spec,
        ),
        compiler_params=pltpu.CompilerParams(dimension_semantics=("parallel",)),
    )(query, key, value, bias,
      wt(wq), b2(bq), wt(wk), b2(bk), wt(wv), b2(bv), wt(wo), b2(bo))
    return out


def reference(query, key, value, params, h, mask=None):
    """Plain-JAX f32 replica of the PyTorch forward (eval mode)."""
    B, S, D = query.shape
    d_k = D // h
    wq, bq, wk, bk, wv, bv, wo, bo = params
    lin = lambda x, w, b: x @ w.T + b
    Q = lin(query, wq, bq).reshape(B, S, h, d_k).transpose(0, 2, 1, 3)
    K = lin(key, wk, bk).reshape(B, S, h, d_k).transpose(0, 2, 1, 3)
    V = lin(value, wv, bv).reshape(B, S, h, d_k).transpose(0, 2, 1, 3)
    scores = jnp.einsum('bhqd,bhkd->bhqk', Q, K) / math.sqrt(d_k)
    if mask is not None:
        scores = jnp.where(mask[:, None] == 0, -1e9, scores)
    p = jax.nn.softmax(scores, axis=-1)
    x = jnp.einsum('bhqk,bhkd->bhqd', p, V).transpose(0, 2, 1, 3).reshape(B, S, D)
    return lin(x, wo, bo)


if __name__ == "__main__":
    B, S, h, D = 2, 8, 4, 32   # batch, seq, heads, d_model  (d_k = 8)
    root = jax.random.PRNGKey(0)
    ks = jax.random.split(root, 16)
    init = 0.1

    query = jax.random.normal(ks[0], (B, S, D), jnp.float32)
    key_in = jax.random.normal(ks[1], (B, S, D), jnp.float32)
    value = jax.random.normal(ks[2], (B, S, D), jnp.float32)

    # 4 Linear(d_model, d_model) layers: Wq, Wk, Wv, Wo (+ biases)
    wq = jax.random.normal(ks[3], (D, D), jnp.float32) * init
    bq = jax.random.normal(ks[4], (D,), jnp.float32) * init
    wk = jax.random.normal(ks[5], (D, D), jnp.float32) * init
    bk = jax.random.normal(ks[6], (D,), jnp.float32) * init
    wv = jax.random.normal(ks[7], (D, D), jnp.float32) * init
    bv = jax.random.normal(ks[8], (D,), jnp.float32) * init
    wo = jax.random.normal(ks[9], (D, D), jnp.float32) * init
    bo = jax.random.normal(ks[10], (D,), jnp.float32) * init
    params = (wq, bq, wk, bk, wv, bv, wo, bo)

    # causal mask to exercise the masked_fill path
    mask = jnp.broadcast_to(jnp.tril(jnp.ones((S, S), jnp.int32))[None], (B, S, S))

    out = multi_headed_attention(query, key_in, value, params, h, mask=mask)
    jax.block_until_ready(out)

    ref_out = reference(query, key_in, value, params, h, mask=mask)
    assert out.shape == (B, S, D)
    # bf16 MXU operands with f32 accumulation -> loosened tolerances.
    rel = float(jnp.linalg.norm(out - ref_out) / jnp.linalg.norm(ref_out))
    assert rel < 3e-2, f"relative error too large: {rel}"
    assert jnp.allclose(out, ref_out, atol=5e-2, rtol=5e-2)
    print("KERNEL_OK")
</pallas_src>

<mosaic_0001>
module attributes {stable_mosaic.version = 11 : i64} {
  func.func @mha_kernel(%arg0: i32, %arg1: memref<1x8x32xf32, #tpu.memory_space<vmem>>, %arg2: memref<1x8x32xf32, #tpu.memory_space<vmem>>, %arg3: memref<1x8x32xf32, #tpu.memory_space<vmem>>, %arg4: memref<1x8x8xf32, #tpu.memory_space<vmem>>, %arg5: memref<32x32xbf16, #tpu.memory_space<vmem>>, %arg6: memref<1x32xf32, #tpu.memory_space<vmem>>, %arg7: memref<32x32xbf16, #tpu.memory_space<vmem>>, %arg8: memref<1x32xf32, #tpu.memory_space<vmem>>, %arg9: memref<32x32xbf16, #tpu.memory_space<vmem>>, %arg10: memref<1x32xf32, #tpu.memory_space<vmem>>, %arg11: memref<32x32xbf16, #tpu.memory_space<vmem>>, %arg12: memref<1x32xf32, #tpu.memory_space<vmem>>, %arg13: memref<1x8x32xf32, #tpu.memory_space<vmem>>) attributes {dimension_semantics = [#tpu.dimension_semantics<parallel>], iteration_bounds = array<i64: 2>, scalar_prefetch = 0 : i64, scratch_operands = 0 : i64, tpu.core_type = #tpu.core_type<tc>, window_params = [{transform_indices = @transform_0, window_bounds = array<i64: 1, 8, 32>}, {transform_indices = @transform_1, window_bounds = array<i64: 1, 8, 32>}, {transform_indices = @transform_2, window_bounds = array<i64: 1, 8, 32>}, {transform_indices = @transform_3, window_bounds = array<i64: 1, 8, 8>}, {pipeline_mode = #tpu.pipeline_mode<synchronous>, transform_indices = @transform_4, window_bounds = array<i64: 32, 32>}, {pipeline_mode = #tpu.pipeline_mode<synchronous>, transform_indices = @transform_5, window_bounds = array<i64: 1, 32>}, {pipeline_mode = #tpu.pipeline_mode<synchronous>, transform_indices = @transform_6, window_bounds = array<i64: 32, 32>}, {pipeline_mode = #tpu.pipeline_mode<synchronous>, transform_indices = @transform_7, window_bounds = array<i64: 1, 32>}, {pipeline_mode = #tpu.pipeline_mode<synchronous>, transform_indices = @transform_8, window_bounds = array<i64: 32, 32>}, {pipeline_mode = #tpu.pipeline_mode<synchronous>, transform_indices = @transform_9, window_bounds = array<i64: 1, 32>}, {pipeline_mode = #tpu.pipeline_mode<synchronous>, transform_indices = @transform_10, window_bounds = array<i64: 32, 32>}, {pipeline_mode = #tpu.pipeline_mode<synchronous>, transform_indices = @transform_11, window_bounds = array<i64: 1, 32>}, {transform_indices = @transform_12, window_bounds = array<i64: 1, 8, 32>}]} {
    %c0 = arith.constant 0 : index
    %c0_0 = arith.constant 0 : index
    %c0_1 = arith.constant 0 : index
    %0 = vector.load %arg1[%c0, %c0_0, %c0_1] : memref<1x8x32xf32, #tpu.memory_space<vmem>>, vector<1x8x32xf32>
    %1 = vector.shape_cast %0 : vector<1x8x32xf32> to vector<8x32xf32>
    %2 = arith.truncf %1 : vector<8x32xf32> to vector<8x32xbf16>
    %c0_2 = arith.constant 0 : index
    %c0_3 = arith.constant 0 : index
    %c0_4 = arith.constant 0 : index
    %3 = vector.load %arg2[%c0_2, %c0_3, %c0_4] : memref<1x8x32xf32, #tpu.memory_space<vmem>>, vector<1x8x32xf32>
    %4 = vector.shape_cast %3 : vector<1x8x32xf32> to vector<8x32xf32>
    %5 = arith.truncf %4 : vector<8x32xf32> to vector<8x32xbf16>
    %c0_5 = arith.constant 0 : index
    %c0_6 = arith.constant 0 : index
    %c0_7 = arith.constant 0 : index
    %6 = vector.load %arg3[%c0_5, %c0_6, %c0_7] : memref<1x8x32xf32, #tpu.memory_space<vmem>>, vector<1x8x32xf32>
    %7 = vector.shape_cast %6 : vector<1x8x32xf32> to vector<8x32xf32>
    %8 = arith.truncf %7 : vector<8x32xf32> to vector<8x32xbf16>
    %c0_8 = arith.constant 0 : index
    %c0_9 = arith.constant 0 : index
    %9 = vector.load %arg5[%c0_8, %c0_9] : memref<32x32xbf16, #tpu.memory_space<vmem>>, vector<32x32xbf16>
    %cst = arith.constant dense<0.000000e+00> : vector<8x32xf32>
    %10 = tpu.matmul %2, %9, %cst {dimension_numbers = #tpu.dot_dimension_numbers<[1], [0], [0], [1], [0, 0, 1, 1], [], []>} : vector<8x32xbf16>, vector<32x32xbf16>, vector<8x32xf32> -> vector<8x32xf32>
    %c0_10 = arith.constant 0 : index
    %c0_11 = arith.constant 0 : index
    %11 = vector.load %arg6[%c0_10, %c0_11] : memref<1x32xf32, #tpu.memory_space<vmem>>, vector<1x32xf32>
    %12 = vector.broadcast %11 : vector<1x32xf32> to vector<8x32xf32>
    %13 = arith.addf %10, %12 : vector<8x32xf32>
    %c0_12 = arith.constant 0 : index
    %c0_13 = arith.constant 0 : index
    %14 = vector.load %arg7[%c0_12, %c0_13] : memref<32x32xbf16, #tpu.memory_space<vmem>>, vector<32x32xbf16>
    %cst_14 = arith.constant dense<0.000000e+00> : vector<8x32xf32>
    %15 = tpu.matmul %5, %14, %cst_14 {dimension_numbers = #tpu.dot_dimension_numbers<[1], [0], [0], [1], [0, 0, 1, 1], [], []>} : vector<8x32xbf16>, vector<32x32xbf16>, vector<8x32xf32> -> vector<8x32xf32>
    %c0_15 = arith.constant 0 : index
    %c0_16 = arith.constant 0 : index
    %16 = vector.load %arg8[%c0_15, %c0_16] : memref<1x32xf32, #tpu.memory_space<vmem>>, vector<1x32xf32>
    %17 = vector.broadcast %16 : vector<1x32xf32> to vector<8x32xf32>
    %18 = arith.addf %15, %17 : vector<8x32xf32>
    %c0_17 = arith.constant 0 : index
    %c0_18 = arith.constant 0 : index
    %19 = vector.load %arg9[%c0_17, %c0_18] : memref<32x32xbf16, #tpu.memory_space<vmem>>, vector<32x32xbf16>
    %cst_19 = arith.constant dense<0.000000e+00> : vector<8x32xf32>
    %20 = tpu.matmul %8, %19, %cst_19 {dimension_numbers = #tpu.dot_dimension_numbers<[1], [0], [0], [1], [0, 0, 1, 1], [], []>} : vector<8x32xbf16>, vector<32x32xbf16>, vector<8x32xf32> -> vector<8x32xf32>
    %c0_20 = arith.constant 0 : index
    %c0_21 = arith.constant 0 : index
    %21 = vector.load %arg10[%c0_20, %c0_21] : memref<1x32xf32, #tpu.memory_space<vmem>>, vector<1x32xf32>
    %22 = vector.broadcast %21 : vector<1x32xf32> to vector<8x32xf32>
    %23 = arith.addf %20, %22 : vector<8x32xf32>
    %cst_22 = arith.constant 0.353553385 : f32
    %24 = vector.broadcast %cst_22 : f32 to vector<8x32xf32>
    %25 = arith.mulf %13, %24 : vector<8x32xf32>
    %26 = vector.shape_cast %25 : vector<8x32xf32> to vector<1x8x32xf32>
    %27 = arith.truncf %26 : vector<1x8x32xf32> to vector<1x8x32xbf16>
    %28 = vector.shape_cast %18 : vector<8x32xf32> to vector<1x8x32xf32>
    %29 = arith.truncf %28 : vector<1x8x32xf32> to vector<1x8x32xbf16>
    %30 = vector.shape_cast %23 : vector<8x32xf32> to vector<1x8x32xf32>
    %31 = arith.truncf %30 : vector<1x8x32xf32> to vector<1x8x32xbf16>
    %c0_23 = arith.constant 0 : index
    %c0_24 = arith.constant 0 : index
    %c0_25 = arith.constant 0 : index
    %32 = vector.load %arg4[%c0_23, %c0_24, %c0_25] : memref<1x8x8xf32, #tpu.memory_space<vmem>>, vector<1x8x8xf32>
    %33 = vector.extract_strided_slice %27 {offsets = [0, 0, 0], sizes = [1, 8, 8], strides = [1, 1, 1]} : vector<1x8x32xbf16> to vector<1x8x8xbf16>
    %34 = vector.extract_strided_slice %29 {offsets = [0, 0, 0], sizes = [1, 8, 8], strides = [1, 1, 1]} : vector<1x8x32xbf16> to vector<1x8x8xbf16>
    %35 = vector.extract_strided_slice %31 {offsets = [0, 0, 0], sizes = [1, 8, 8], strides = [1, 1, 1]} : vector<1x8x32xbf16> to vector<1x8x8xbf16>
    "tpu.trace_start"() <{level = 10 : i32, message = "bqd,bkd->bqk"}> : () -> ()
    %cst_26 = arith.constant dense<0.000000e+00> : vector<1x8x8xf32>
    %36 = tpu.matmul %33, %34, %cst_26 {dimension_numbers = #tpu.dot_dimension_numbers<[2], [2], [1], [1], [0, 0, 0, 1, 1, 1], [0], [0]>} : vector<1x8x8xbf16>, vector<1x8x8xbf16>, vector<1x8x8xf32> -> vector<1x8x8xf32>
    "tpu.trace_stop"() : () -> ()
    %37 = arith.addf %36, %32 : vector<1x8x8xf32>
    %cst_27 = arith.constant dense<0xFF800000> : vector<1x8xf32>
    %38 = vector.multi_reduction <maximumf>, %37, %cst_27 [2] : vector<1x8x8xf32> to vector<1x8xf32>
    %39 = vector.shape_cast %38 : vector<1x8xf32> to vector<1x8x1xf32>
    %40 = vector.broadcast %39 : vector<1x8x1xf32> to vector<1x8x8xf32>
    %41 = arith.subf %37, %40 : vector<1x8x8xf32>
    %42 = math.exp %41 : vector<1x8x8xf32>
    %cst_28 = arith.constant dense<0.000000e+00> : vector<1x8xf32>
    %43 = vector.multi_reduction <add>, %42, %cst_28 [2] : vector<1x8x8xf32> to vector<1x8xf32>
    %44 = vector.shape_cast %43 : vector<1x8xf32> to vector<1x8x1xf32>
    %45 = tpu.reciprocal %44 {approx = true} : vector<1x8x1xf32> -> vector<1x8x1xf32>
    %46 = vector.broadcast %45 : vector<1x8x1xf32> to vector<1x8x8xf32>
    %47 = arith.mulf %42, %46 : vector<1x8x8xf32>
    %48 = arith.truncf %47 : vector<1x8x8xf32> to vector<1x8x8xbf16>
    "tpu.trace_start"() <{level = 10 : i32, message = "bqk,bkd->bqd"}> : () -> ()
    %cst_29 = arith.constant dense<0.000000e+00> : vector<1x8x8xf32>
    %49 = tpu.matmul %48, %35, %cst_29 {dimension_numbers = #tpu.dot_dimension_numbers<[2], [1], [1], [2], [0, 0, 0, 1, 1, 2], [0], [0]>} : vector<1x8x8xbf16>, vector<1x8x8xbf16>, vector<1x8x8xf32> -> vector<1x8x8xf32>
    "tpu.trace_stop"() : () -> ()
    %50 = vector.extract_strided_slice %27 {offsets = [0, 0, 8], sizes = [1, 8, 8], strides = [1, 1, 1]} : vector<1x8x32xbf16> to vector<1x8x8xbf16>
    %51 = vector.extract_strided_slice %29 {offsets = [0, 0, 8], sizes = [1, 8, 8], strides = [1, 1, 1]} : vector<1x8x32xbf16> to vector<1x8x8xbf16>
    %52 = vector.extract_strided_slice %31 {offsets = [0, 0, 8], sizes = [1, 8, 8], strides = [1, 1, 1]} : vector<1x8x32xbf16> to vector<1x8x8xbf16>
    "tpu.trace_start"() <{level = 10 : i32, message = "bqd,bkd->bqk"}> : () -> ()
    %cst_30 = arith.constant dense<0.000000e+00> : vector<1x8x8xf32>
    %53 = tpu.matmul %50, %51, %cst_30 {dimension_numbers = #tpu.dot_dimension_numbers<[2], [2], [1], [1], [0, 0, 0, 1, 1, 1], [0], [0]>} : vector<1x8x8xbf16>, vector<1x8x8xbf16>, vector<1x8x8xf32> -> vector<1x8x8xf32>
    "tpu.trace_stop"() : () -> ()
    %54 = arith.addf %53, %32 : vector<1x8x8xf32>
    %cst_31 = arith.constant dense<0xFF800000> : vector<1x8xf32>
    %55 = vector.multi_reduction <maximumf>, %54, %cst_31 [2] : vector<1x8x8xf32> to vector<1x8xf32>
    %56 = vector.shape_cast %55 : vector<1x8xf32> to vector<1x8x1xf32>
    %57 = vector.broadcast %56 : vector<1x8x1xf32> to vector<1x8x8xf32>
    %58 = arith.subf %54, %57 : vector<1x8x8xf32>
    %59 = math.exp %58 : vector<1x8x8xf32>
    %cst_32 = arith.constant dense<0.000000e+00> : vector<1x8xf32>
    %60 = vector.multi_reduction <add>, %59, %cst_32 [2] : vector<1x8x8xf32> to vector<1x8xf32>
    %61 = vector.shape_cast %60 : vector<1x8xf32> to vector<1x8x1xf32>
    %62 = tpu.reciprocal %61 {approx = true} : vector<1x8x1xf32> -> vector<1x8x1xf32>
    %63 = vector.broadcast %62 : vector<1x8x1xf32> to vector<1x8x8xf32>
    %64 = arith.mulf %59, %63 : vector<1x8x8xf32>
    %65 = arith.truncf %64 : vector<1x8x8xf32> to vector<1x8x8xbf16>
    "tpu.trace_start"() <{level = 10 : i32, message = "bqk,bkd->bqd"}> : () -> ()
    %cst_33 = arith.constant dense<0.000000e+00> : vector<1x8x8xf32>
    %66 = tpu.matmul %65, %52, %cst_33 {dimension_numbers = #tpu.dot_dimension_numbers<[2], [1], [1], [2], [0, 0, 0, 1, 1, 2], [0], [0]>} : vector<1x8x8xbf16>, vector<1x8x8xbf16>, vector<1x8x8xf32> -> vector<1x8x8xf32>
    "tpu.trace_stop"() : () -> ()
    %67 = vector.extract_strided_slice %27 {offsets = [0, 0, 16], sizes = [1, 8, 8], strides = [1, 1, 1]} : vector<1x8x32xbf16> to vector<1x8x8xbf16>
    %68 = vector.extract_strided_slice %29 {offsets = [0, 0, 16], sizes = [1, 8, 8], strides = [1, 1, 1]} : vector<1x8x32xbf16> to vector<1x8x8xbf16>
    %69 = vector.extract_strided_slice %31 {offsets = [0, 0, 16], sizes = [1, 8, 8], strides = [1, 1, 1]} : vector<1x8x32xbf16> to vector<1x8x8xbf16>
    "tpu.trace_start"() <{level = 10 : i32, message = "bqd,bkd->bqk"}> : () -> ()
    %cst_34 = arith.constant dense<0.000000e+00> : vector<1x8x8xf32>
    %70 = tpu.matmul %67, %68, %cst_34 {dimension_numbers = #tpu.dot_dimension_numbers<[2], [2], [1], [1], [0, 0, 0, 1, 1, 1], [0], [0]>} : vector<1x8x8xbf16>, vector<1x8x8xbf16>, vector<1x8x8xf32> -> vector<1x8x8xf32>
    "tpu.trace_stop"() : () -> ()
    %71 = arith.addf %70, %32 : vector<1x8x8xf32>
    %cst_35 = arith.constant dense<0xFF800000> : vector<1x8xf32>
    %72 = vector.multi_reduction <maximumf>, %71, %cst_35 [2] : vector<1x8x8xf32> to vector<1x8xf32>
    %73 = vector.shape_cast %72 : vector<1x8xf32> to vector<1x8x1xf32>
    %74 = vector.broadcast %73 : vector<1x8x1xf32> to vector<1x8x8xf32>
    %75 = arith.subf %71, %74 : vector<1x8x8xf32>
    %76 = math.exp %75 : vector<1x8x8xf32>
    %cst_36 = arith.constant dense<0.000000e+00> : vector<1x8xf32>
    %77 = vector.multi_reduction <add>, %76, %cst_36 [2] : vector<1x8x8xf32> to vector<1x8xf32>
    %78 = vector.shape_cast %77 : vector<1x8xf32> to vector<1x8x1xf32>
    %79 = tpu.reciprocal %78 {approx = true} : vector<1x8x1xf32> -> vector<1x8x1xf32>
    %80 = vector.broadcast %79 : vector<1x8x1xf32> to vector<1x8x8xf32>
    %81 = arith.mulf %76, %80 : vector<1x8x8xf32>
    %82 = arith.truncf %81 : vector<1x8x8xf32> to vector<1x8x8xbf16>
    "tpu.trace_start"() <{level = 10 : i32, message = "bqk,bkd->bqd"}> : () -> ()
    %cst_37 = arith.constant dense<0.000000e+00> : vector<1x8x8xf32>
    %83 = tpu.matmul %82, %69, %cst_37 {dimension_numbers = #tpu.dot_dimension_numbers<[2], [1], [1], [2], [0, 0, 0, 1, 1, 2], [0], [0]>} : vector<1x8x8xbf16>, vector<1x8x8xbf16>, vector<1x8x8xf32> -> vector<1x8x8xf32>
    "tpu.trace_stop"() : () -> ()
    %84 = vector.extract_strided_slice %27 {offsets = [0, 0, 24], sizes = [1, 8, 8], strides = [1, 1, 1]} : vector<1x8x32xbf16> to vector<1x8x8xbf16>
    %85 = vector.extract_strided_slice %29 {offsets = [0, 0, 24], sizes = [1, 8, 8], strides = [1, 1, 1]} : vector<1x8x32xbf16> to vector<1x8x8xbf16>
    %86 = vector.extract_strided_slice %31 {offsets = [0, 0, 24], sizes = [1, 8, 8], strides = [1, 1, 1]} : vector<1x8x32xbf16> to vector<1x8x8xbf16>
    "tpu.trace_start"() <{level = 10 : i32, message = "bqd,bkd->bqk"}> : () -> ()
    %cst_38 = arith.constant dense<0.000000e+00> : vector<1x8x8xf32>
    %87 = tpu.matmul %84, %85, %cst_38 {dimension_numbers = #tpu.dot_dimension_numbers<[2], [2], [1], [1], [0, 0, 0, 1, 1, 1], [0], [0]>} : vector<1x8x8xbf16>, vector<1x8x8xbf16>, vector<1x8x8xf32> -> vector<1x8x8xf32>
    "tpu.trace_stop"() : () -> ()
    %88 = arith.addf %87, %32 : vector<1x8x8xf32>
    %cst_39 = arith.constant dense<0xFF800000> : vector<1x8xf32>
    %89 = vector.multi_reduction <maximumf>, %88, %cst_39 [2] : vector<1x8x8xf32> to vector<1x8xf32>
    %90 = vector.shape_cast %89 : vector<1x8xf32> to vector<1x8x1xf32>
    %91 = vector.broadcast %90 : vector<1x8x1xf32> to vector<1x8x8xf32>
    %92 = arith.subf %88, %91 : vector<1x8x8xf32>
    %93 = math.exp %92 : vector<1x8x8xf32>
    %cst_40 = arith.constant dense<0.000000e+00> : vector<1x8xf32>
    %94 = vector.multi_reduction <add>, %93, %cst_40 [2] : vector<1x8x8xf32> to vector<1x8xf32>
    %95 = vector.shape_cast %94 : vector<1x8xf32> to vector<1x8x1xf32>
    %96 = tpu.reciprocal %95 {approx = true} : vector<1x8x1xf32> -> vector<1x8x1xf32>
    %97 = vector.broadcast %96 : vector<1x8x1xf32> to vector<1x8x8xf32>
    %98 = arith.mulf %93, %97 : vector<1x8x8xf32>
    %99 = arith.truncf %98 : vector<1x8x8xf32> to vector<1x8x8xbf16>
    "tpu.trace_start"() <{level = 10 : i32, message = "bqk,bkd->bqd"}> : () -> ()
    %cst_41 = arith.constant dense<0.000000e+00> : vector<1x8x8xf32>
    %100 = tpu.matmul %99, %86, %cst_41 {dimension_numbers = #tpu.dot_dimension_numbers<[2], [1], [1], [2], [0, 0, 0, 1, 1, 2], [0], [0]>} : vector<1x8x8xbf16>, vector<1x8x8xbf16>, vector<1x8x8xf32> -> vector<1x8x8xf32>
    "tpu.trace_stop"() : () -> ()
    %101 = tpu.concatenate %49, %66, %83, %100 in 2 : vector<1x8x8xf32>, vector<1x8x8xf32>, vector<1x8x8xf32>, vector<1x8x8xf32> -> vector<1x8x32xf32>
    %102 = vector.shape_cast %101 : vector<1x8x32xf32> to vector<8x32xf32>
    %103 = arith.truncf %102 : vector<8x32xf32> to vector<8x32xbf16>
    %c0_42 = arith.constant 0 : index
    %c0_43 = arith.constant 0 : index
    %104 = vector.load %arg11[%c0_42, %c0_43] : memref<32x32xbf16, #tpu.memory_space<vmem>>, vector<32x32xbf16>
    %cst_44 = arith.constant dense<0.000000e+00> : vector<8x32xf32>
    %105 = tpu.matmul %103, %104, %cst_44 {dimension_numbers = #tpu.dot_dimension_numbers<[1], [0], [0], [1], [0, 0, 1, 1], [], []>} : vector<8x32xbf16>, vector<32x32xbf16>, vector<8x32xf32> -> vector<8x32xf32>
    %c0_45 = arith.constant 0 : index
    %c0_46 = arith.constant 0 : index
    %106 = vector.load %arg12[%c0_45, %c0_46] : memref<1x32xf32, #tpu.memory_space<vmem>>, vector<1x32xf32>
    %107 = vector.broadcast %106 : vector<1x32xf32> to vector<8x32xf32>
    %108 = arith.addf %105, %107 : vector<8x32xf32>
    %109 = vector.shape_cast %108 : vector<8x32xf32> to vector<1x8x32xf32>
    %c0_47 = arith.constant 0 : index
    %c0_48 = arith.constant 0 : index
    %c0_49 = arith.constant 0 : index
    %110 = vector.load %arg13[%c0_47, %c0_48, %c0_49] : memref<1x8x32xf32, #tpu.memory_space<vmem>>, vector<1x8x32xf32>
    tpu.vector_store %arg13[%c0_47, %c0_48, %c0_49], %109 {strides = array<i32>} : memref<1x8x32xf32, #tpu.memory_space<vmem>>, vector<1x8x32xf32>,
    return
  }
  func.func @transform_0(%arg0: i32) -> (i32, i32, i32) {
    %c0_i32 = arith.constant 0 : i32
    %c0_i32_0 = arith.constant 0 : i32
    %c0_i32_1 = arith.constant 0 : i32
    return %arg0, %c0_i32, %c0_i32_0 : i32, i32, i32
  }
  func.func @transform_1(%arg0: i32) -> (i32, i32, i32) {
    %c0_i32 = arith.constant 0 : i32
    %c0_i32_0 = arith.constant 0 : i32
    %c0_i32_1 = arith.constant 0 : i32
    return %arg0, %c0_i32, %c0_i32_0 : i32, i32, i32
  }
  func.func @transform_2(%arg0: i32) -> (i32, i32, i32) {
    %c0_i32 = arith.constant 0 : i32
    %c0_i32_0 = arith.constant 0 : i32
    %c0_i32_1 = arith.constant 0 : i32
    return %arg0, %c0_i32, %c0_i32_0 : i32, i32, i32
  }
  func.func @transform_3(%arg0: i32) -> (i32, i32, i32) {
    %c0_i32 = arith.constant 0 : i32
    %c0_i32_0 = arith.constant 0 : i32
    %c0_i32_1 = arith.constant 0 : i32
    return %arg0, %c0_i32, %c0_i32_0 : i32, i32, i32
  }
  func.func @transform_4(%arg0: i32) -> (i32, i32) {
    %c0_i32 = arith.constant 0 : i32
    %c0_i32_0 = arith.constant 0 : i32
    %c0_i32_1 = arith.constant 0 : i32
    return %c0_i32, %c0_i32_0 : i32, i32
  }
  func.func @transform_5(%arg0: i32) -> (i32, i32) {
    %c0_i32 = arith.constant 0 : i32
    %c0_i32_0 = arith.constant 0 : i32
    %c0_i32_1 = arith.constant 0 : i32
    return %c0_i32, %c0_i32_0 : i32, i32
  }
  func.func @transform_6(%arg0: i32) -> (i32, i32) {
    %c0_i32 = arith.constant 0 : i32
    %c0_i32_0 = arith.constant 0 : i32
    %c0_i32_1 = arith.constant 0 : i32
    return %c0_i32, %c0_i32_0 : i32, i32
  }
  func.func @transform_7(%arg0: i32) -> (i32, i32) {
    %c0_i32 = arith.constant 0 : i32
    %c0_i32_0 = arith.constant 0 : i32
    %c0_i32_1 = arith.constant 0 : i32
    return %c0_i32, %c0_i32_0 : i32, i32
  }
  func.func @transform_8(%arg0: i32) -> (i32, i32) {
    %c0_i32 = arith.constant 0 : i32
    %c0_i32_0 = arith.constant 0 : i32
    %c0_i32_1 = arith.constant 0 : i32
    return %c0_i32, %c0_i32_0 : i32, i32
  }
  func.func @transform_9(%arg0: i32) -> (i32, i32) {
    %c0_i32 = arith.constant 0 : i32
    %c0_i32_0 = arith.constant 0 : i32
    %c0_i32_1 = arith.constant 0 : i32
    return %c0_i32, %c0_i32_0 : i32, i32
  }
  func.func @transform_10(%arg0: i32) -> (i32, i32) {
    %c0_i32 = arith.constant 0 : i32
    %c0_i32_0 = arith.constant 0 : i32
    %c0_i32_1 = arith.constant 0 : i32
    return %c0_i32, %c0_i32_0 : i32, i32
  }
  func.func @transform_11(%arg0: i32) -> (i32, i32) {
    %c0_i32 = arith.constant 0 : i32
    %c0_i32_0 = arith.constant 0 : i32
    %c0_i32_1 = arith.constant 0 : i32
    return %c0_i32, %c0_i32_0 : i32, i32
  }
  func.func @transform_12(%arg0: i32) -> (i32, i32, i32) {
    %c0_i32 = arith.constant 0 : i32
    %c0_i32_0 = arith.constant 0 : i32
    %c0_i32_1 = arith.constant 0 : i32
    return %arg0, %c0_i32, %c0_i32_0 : i32, i32, i32
  }
}

</mosaic_0001>

<bundles_post_ra>
// kernel: tpu_custom_call.1
= control target key start
LH: loop header
LB: loop body
LE: loop exit
PB: predicated region body
PF: predicated region fallthrough
CT: control target
= control target key end

     0   :  { %s2613_s0 = inlined_call_operand.hbm [shape: f32[2,8,32], index: 0, kind: input, shape index: {}]   ;;  %s2614_s1 = inlined_call_operand.hbm [shape: f32[2,8,32], index: 1, kind: input, shape index: {}]   ;;  %s2615_s2 = inlined_call_operand.hbm [shape: f32[2,8,32], index: 2, kind: input, shape index: {}]   ;;  %s2616_s3 = inlined_call_operand.hbm [shape: f32[2,8,8], index: 3, kind: input, shape index: {}]   ;;  %s2617_s4 = inlined_call_operand.hbm [shape: bf16[32,32], index: 4, kind: input, shape index: {}]   ;;  %s2618_s5 = inlined_call_operand.vmem [shape: f32[1,32], index: 5, kind: input, shape index: {}]   ;;  %s2619_s6 = inlined_call_operand.vmem [shape: bf16[32,32], index: 6, kind: input, shape index: {}]   ;;  %s2620_s7 = inlined_call_operand.vmem [shape: f32[1,32], index: 7, kind: input, shape index: {}]   ;;  %s2621_s8 = inlined_call_operand.hbm [shape: bf16[32,32], index: 8, kind: input, shape index: {}]   ;;  %s2622_s9 = inlined_call_operand.hbm [shape: f32[1,32], index: 9, kind: input, shape index: {}]   ;;  %s2623_s10 = inlined_call_operand.vmem [shape: bf16[32,32], index: 10, kind: input, shape index: {}]   ;;  %s2624_s11 = inlined_call_operand.vmem [shape: f32[1,32], index: 11, kind: input, shape index: {}]   ;;  %s2625_s12 = inlined_call_operand.hbm [shape: f32[2,8,32], index: 12, kind: output, shape index: {}]  }
   0x1   :  { %2645 = sst [smem:[#allocation26_spill]] %s2614_s1 }
   0x2   :  { %2646 = sst [smem:[#allocation27_spill]] %s2617_s4 }
   0x3   :  { %2647 = sst [smem:[#allocation28_spill]] %s2621_s8 }
   0x4   :  { %2648 = sst [smem:[#allocation29_spill]] %s2623_s10 }
   0x5   :  { %2649 = sst [smem:[#allocation30_spill]] %s2624_s11 }
   0x6   :  { %2650 = sst [smem:[#allocation31_spill]] %s2625_s12 }
   0x7   :  { %17 = vsyncpa [#allocation3], 0 }
   0x8   :  { %19 = vsyncpa [#allocation3 + $0x1], 0 }
   0x9   :  { %20 = vsyncpa [#allocation6], 0 }
   0xa   :  { %22 = vsyncpa [#allocation6 + $0x1], 0 }
   0xb   :  { %23 = vsyncpa [#allocation9], 0 }
   0xc   :  { %25 = vsyncpa [#allocation9 + $0x1], 0 }
   0xd   :  { %26 = vsyncpa [#allocation12], 0 }
   0xe   :  { %27 = vsyncpa [#allocation4], 0 }
   0xf   :  { %29 = vsyncpa [#allocation4 + $0x1], 0  ;;  %s2147_s21 = smov 0   ;;  %s2149_s22 = smov 0  }
  0x10   :  { %s2151_s23 = smov 0   ;;  %s2153_s24 = smov 0  }
  0x11 LB: > { %2651 = sst [smem:[#allocation21_spill]] %s2050_s21  ;;  %s2168_s25 = sadd.s32 4294967295, %s2062_s24   ;;  %s2062_s24 = sphi %s2153_s24, %s2690_s24   ;;  %s2058_s23 = sphi %s2151_s23, %s2694_s23   ;;  %s2054_s22 = sphi %s2149_s22, %s2693_s22   ;;  %s2050_s21 = sphi %s2147_s21, %s2692_s21  }
  0x12   : > { %s1491_s26 = sadd.s32 4294967294, %s2062_s24   ;;  %p55_p0 = scmp.ne.s32.totalorder %s2054_s22, %s2050_s21 }
  0x13   : > { %p2627_p1 = scmp.eq.s32.totalorder %s2168_s25, 0  ;;  %p331_p3 = scmp.eq.s32.totalorder %s1491_s26, 1 }
  0x14   : > { %p1492_p5 = scmp.ge.s32.totalorder %s2062_s24, 1  ;;  %p338_p7 = scmp.lt.s32.totalorder %s2062_s24, 3 }
  0x15   : > { %p2177_p4 = por %p2627_p1, %p55_p0  ;;  %p2182_p6 = por %p331_p3, %p55_p0 }
  0x16   : > { %p2187_p8 = pnand %p1492_p5, %p338_p7  ;;  %s2064_s30 = smov [#allocation10]  }
  0x17   : > { %s2652_s27 = scalar_select %p2177_p4, 1, 0 }
  0x18   : > { %s2653_s28 = scalar_select %p2182_p6, 1, 0 }
  0x19   : > { %s2655_s29 = scalar_select %p2187_p8, 1, 0 }
  0x1a   : > { %2654 = sst [smem:[#allocation22_spill]] %s2653_s28  ;;  %s350_s13 = sshll.u32 %s2064_s30, 4  ;;  %s2191_s13 = int_to_ptr.vmem [resolvable:$true] %s350_s13 }
  0x1b   : > { %p1672_p9 = pneg %p2187_p8  ;;  %s2065_s15 = smov [#allocation11]  }
  0x1c   : > { %s372_s16 = sshll.u32 %s2065_s15, 4  ;;  %s2657_s4 = sld [smem:[#allocation27_spill]]  ;;  %s2202_s16 = int_to_ptr.vmem [resolvable:$true] %s372_s16 }
  0x1d   : > { %p2198_p11 = pnand %p1672_p9, %p2627_p1 }
  0x1f   : > { %s2656_s14 = scalar_select %p2198_p11, 1, 0 }
  0x20   : > { %p2212_p13 = pneg %p2198_p11 }
  0x22   : > { %s1776_s19 = scalar_lea.hbm %s2657_s4, 256 }
  0x23   : > { %p1777_p12 = scmp.ne.s32.totalorder %s2657_s4, %s1776_s19  ;;  %p1783_p5 = scmp.lt.u32.totalorder %s1776_s19, %s2657_s4 }
  0x24   : > { %s2658_s30 = scalar_select %p2212_p13, 1, 0 }
  0x25   : > { %p1779_p0 = pnand %p2212_p13, %p1777_p12 }
  0x27   : > { %p1780_p3 = pneg %p1779_p0 }
  0x29   : > { %p1785_p7 = pnand %p1783_p5, %p1780_p3 }
  0x2b   : > { %1788 = shalt.err (!%p1785_p7)
}
  0x2c   : > { %s1789_s17 = scalar_lea.vmem %s2191_s13, 256  ;;  %p1797_p2 = scmp.lt.s32.totalorder %s2191_s13, %s2191_s13 }
  0x2d   : > { %p1790_p9 = scmp.ne.s32.totalorder %s2191_s13, %s1789_s17  ;;  %p1798_p6 = scmp.lt.s32.totalorder %s1789_s17, %s1789_s17 }
  0x2f   : > { %p1792_p10 = pnand %p1790_p9, %p2212_p13  ;;  %p1799_p12 = por %p1798_p6, %p1797_p2 }
  0x31   : > { %p1793_p1 = pneg %p1792_p10 }
  0x33   : > { %p1800_p0 = pnand %p1799_p12, %p1793_p1 }
  0x35   : > { %1803 = shalt.err (!%p1800_p0)
}
  0x36   : > { %s2066_s18 = smov 64   ;;  %s2067_s28 = smov 4  }
  0x37   : > { %1675 = dma.hbm_to_vmem [thread:$0]  (!%p2198_p11), %s2657_s4, 256, %s2191_s13, [#allocation9], %s2066_s18, %s2066_s18, %s2067_s28  }
  0x38   : > { %s2659_s8 = sld [smem:[#allocation28_spill]] }
  0x3e   : > { %s1804_s21 = scalar_lea.hbm %s2659_s8, 256 }
  0x3f   : > { %p1805_p2 = scmp.ne.s32.totalorder %s2659_s8, %s1804_s21  ;;  %p1811_p10 = scmp.lt.u32.totalorder %s1804_s21, %s2659_s8 }
  0x41   : > { %p1807_p1 = pnand %p1805_p2, %p2212_p13 }
  0x43   : > { %p1808_p6 = pneg %p1807_p1 }
  0x45   : > { %p1813_p3 = pnand %p1811_p10, %p1808_p6 }
  0x47   : > { %1816 = shalt.err (!%p1813_p3)
}
  0x48   : > { %s1817_s13 = scalar_lea.vmem %s2202_s16, 256  ;;  %p1825_p12 = scmp.lt.s32.totalorder %s2202_s16, %s2202_s16 }
  0x49   : > { %p1818_p5 = scmp.ne.s32.totalorder %s2202_s16, %s1817_s13  ;;  %p1826_p0 = scmp.lt.s32.totalorder %s1817_s13, %s1817_s13 }
  0x4b   : > { %p1820_p7 = pnand %p1818_p5, %p2212_p13  ;;  %p1827_p2 = por %p1826_p0, %p1825_p12 }
  0x4d   : > { %p1821_p9 = pneg %p1820_p7 }
  0x4f   : > { %p1828_p1 = pnand %p1827_p2, %p1821_p9 }
  0x51   : > { %1831 = shalt.err (!%p1828_p1)
}
  0x52   : > { %1678 = dma.hbm_to_vmem [thread:$0]  (!%p2198_p11), %s2659_s8, 256, %s2202_s16, [#allocation12], %s2066_s18, %s2066_s18, %s2067_s28  }
  0x53   : > { %s2257_s12 = sadd.s32 1, %s2062_s24   ;;  %s42_s21 = sadd.s32 1, %s2058_s23 }
  0x54   : > { %2660 = sst [smem:[#allocation23_spill]] %s2257_s12  ;;  %s39_s19 = ssub.s32 %s2062_s24, %s2257_s12 }
  0x55   : > { %p49_p6 = scmp.ne.s32.totalorder %s2058_s23, %s2054_s22  ;;  %p40_p10 = scmp.eq.s32.totalorder %s39_s19, 0 }
  0x56   : > { %p50_p3 = scmp.eq.s32.totalorder %s2062_s24, 0  ;;  %p2661_p5 = scmp.eq.s32.totalorder %s2168_s25, 1 }
  0x57   : > { %p1702_p9 = scmp.lt.s32.totalorder %s2062_s24, 2  ;;  %s2631_s15 = sand.u32 1, %s2058_s23  }
  0x58   : > { %p2267_p7 = por %p2661_p5, %p49_p6  ;;  %p51_p12 = por %p50_p3, %p49_p6 }
  0x59   : > { %s2273_s26 = scalar_select %p40_p10, %s2058_s23, %s42_s21  }
  0x5a   : > { %s2662_s20 = scalar_select %p2267_p7, 1, 0 }
  0x5b   : > { %2664 = sst [smem:[#allocation25_spill]] %s2273_s26  ;;  %s2278_s16 = sshll.u32 %s2631_s15, 3 }
  0x5c   : > { %2663 = sst [smem:[#allocation24_spill]] %s2662_s20  ;;  %s2281_s18 = sshll.u32 %s2062_s24, 7 }
  0x5d   : > { %p2283_p0 = pnand %p1702_p9, %p51_p12  ;;  %s2636_s17 = sand.u32 1, %s2062_s24  }
  0x5e   : > { %s2666_s1 = sld [smem:[#allocation26_spill]]  ;;  %s425_s21 = scalar_lea.vmem [#allocation5], %s2278_s16 }
  0x5f   : > { %s2665_s28 = scalar_select %p2283_p0, 1, 0 }
  0x60   : > { %s432_s19 = sshll.u32 %s425_s21, 4  ;;  %s2299_s15 = scalar_lea.sflag [#allocation6], %s2636_s17  ;;  %s2295_s19 = int_to_ptr.vmem [resolvable:$true] %s432_s19 }
  0x61   : > { %p2305_p1 = pneg %p2283_p0 }
  0x64   : > { %s2292_s11 = scalar_lea.hbm %s2666_s1, %s2281_s18  ;;  %s1837_s21 = scalar_lea.hbm %s2666_s1, 256 }
  0x65   : > { %s1832_s4 = scalar_lea.hbm %s2292_s11, 128  ;;  %p1838_p3 = scmp.lt.u32.totalorder %s2292_s11, %s2666_s1 }
  0x66   : > { %p1833_p2 = scmp.ne.s32.totalorder %s2292_s11, %s1832_s4  ;;  %p1839_p5 = scmp.lt.u32.totalorder %s1837_s21, %s1832_s4 }
  0x67   : > { %p1841_p12 = scmp.lt.u32.totalorder %s1832_s4, %s2292_s11 }
  0x68   : > { %p1835_p6 = pnand %p2305_p1, %p1833_p2  ;;  %p1840_p9 = por %p1839_p5, %p1838_p3 }
  0x6a   : > { %p1836_p10 = pneg %p1835_p6  ;;  %p1842_p7 = por %p1841_p12, %p1840_p9 }
  0x6c   : > { %p1843_p4 = pnand %p1842_p7, %p1836_p10 }
  0x6e   : > { %1846 = shalt.err (!%p1843_p4)
}
  0x6f   : > { %s1847_s17 = scalar_lea.vmem %s2295_s19, 128  ;;  %s2068_s13 = smov [#allocation5]  }
  0x70   : > { %p1848_p2 = scmp.ne.s32.totalorder %s2295_s19, %s1847_s17  ;;  %s1852_s10 = sshll.u32 %s2068_s13, 4  ;;  %s1853_s10 = int_to_ptr.vmem [resolvable:$false] %s1852_s10 }
  0x71   : > { %s1854_s12 = scalar_lea.vmem %s1853_s10, 256  ;;  %p1855_p11 = scmp.lt.s32.totalorder %s2295_s19, %s1853_s10 }
  0x72   : > { %p1850_p6 = pnand %p1848_p2, %p2305_p1  ;;  %p1856_p13 = scmp.lt.s32.totalorder %s1854_s12, %s1847_s17 }
  0x74   : > { %p1851_p8 = pneg %p1850_p6  ;;  %p1857_p3 = por %p1856_p13, %p1855_p11 }
  0x76   : > { %p1858_p5 = pnand %p1857_p3, %p1851_p8 }
  0x78   : > { %1861 = shalt.err (!%p1858_p5)
}
  0x79   : > { %1688 = dma.hbm_to_vmem [thread:$0]  (!%p2283_p0), %s2292_s11, 128, %s2295_s19, %s2299_s15  }
  0x7a   : > { %s2069_s4 = smov [#allocation13]   ;;  %s1862_s13 = scalar_lea.hbm %s2622_s9, 16 }
  0x7b   : > { %s386_s26 = sshll.u32 %s2069_s4, 4  ;;  %p1863_p4 = scmp.ne.s32.totalorder %s2622_s9, %s1862_s13  ;;  %s387_s26 = int_to_ptr.vmem [resolvable:$true] %s386_s26 }
  0x7c   : > { %p2668_p8 = scmp.ne.s32.totalorder %s2658_s30, 0  ;;  %p1869_p7 = scmp.lt.u32.totalorder %s1862_s13, %s2622_s9 }
  0x7e   : > { %p1865_p11 = pnand %p1863_p4, %p2668_p8 }
  0x80   : > { %p1866_p13 = pneg %p1865_p11 }
  0x82   : > { %p1871_p10 = pnand %p1869_p7, %p1866_p13 }
  0x84   : > { %1874 = shalt.err (!%p1871_p10)
}
  0x85   : > { %s1875_s11 = scalar_lea.vmem %s387_s26, 16  ;;  %s1882_s1 = scalar_lea.vmem %s387_s26, 32 }
  0x86   : > { %p1876_p9 = scmp.ne.s32.totalorder %s387_s26, %s1875_s11  ;;  %p1883_p6 = scmp.lt.s32.totalorder %s387_s26, %s387_s26 }
  0x87   : > { %p1884_p3 = scmp.lt.s32.totalorder %s1882_s1, %s1875_s11 }
  0x88   : > { %p1878_p12 = pnand %p1876_p9, %p2668_p8 }
  0x89   : > { %p1885_p5 = por %p1884_p3, %p1883_p6 }
  0x8a   : > { %p1879_p2 = pneg %p1878_p12 }
  0x8c   : > { %p1886_p0 = pnand %p1885_p5, %p1879_p2 }
  0x8e   : > { %1889 = shalt.err (!%p1886_p0)
}
  0x8f   : > { %p2669_p4 = scmp.ne.s32.totalorder %s2656_s14, 0  ;;  %s2351_s21 = scalar_lea.hbm %s2613_s0, %s2281_s18 }
  0x90   : > { %s407_s13 = scalar_lea.vmem [#allocation2], %s2278_s16  ;;  %s2670_s14 = sand.u32 1, %s2058_s23  }
  0x91   : > { %1681 = dma.hbm_to_vmem [thread:$0]  (!%p2669_p4), %s2622_s9, 16, %s387_s26, [#allocation12]  }
  0x92   : > { %s414_s10 = sshll.u32 %s407_s13, 4  ;;  %s404_s17 = scalar_lea.sflag [#allocation3], %s2670_s14  ;;  %s415_s10 = int_to_ptr.vmem [resolvable:$true] %s414_s10 }
  0x93   : > { %s1890_s12 = scalar_lea.hbm %s2351_s21, 128  ;;  %s1895_s1 = scalar_lea.hbm %s2613_s0, 256 }
  0x94   : > { %p1891_p0 = scmp.ne.s32.totalorder %s2351_s21, %s1890_s12  ;;  %p1896_p13 = scmp.lt.u32.totalorder %s2351_s21, %s2613_s0 }
  0x95   : > { %p1897_p7 = scmp.lt.u32.totalorder %s1895_s1, %s1890_s12  ;;  %p1899_p9 = scmp.lt.u32.totalorder %s1890_s12, %s2351_s21 }
  0x96   : > { %p1893_p8 = pnand %p1891_p0, %p2305_p1 }
  0x97   : > { %p1898_p10 = por %p1897_p7, %p1896_p13 }
  0x98   : > { %p1894_p11 = pneg %p1893_p8 }
  0x99   : > { %p1900_p12 = por %p1899_p9, %p1898_p10 }
  0x9b   : > { %p1901_p2 = pnand %p1900_p12, %p1894_p11 }
  0x9d   : > { %1904 = shalt.err (!%p1901_p2)
}
  0x9e   : > { %s1905_s4 = scalar_lea.vmem %s415_s10, 128  ;;  %s2070_s30 = smov [#allocation2]  }
  0x9f   : > { %p1906_p6 = scmp.ne.s32.totalorder %s415_s10, %s1905_s4  ;;  %s1910_s13 = sshll.u32 %s2070_s30, 4  ;;  %s1911_s13 = int_to_ptr.vmem [resolvable:$false] %s1910_s13 }
  0xa0   : > { %s1912_s14 = scalar_lea.vmem %s1911_s13, 256  ;;  %p1913_p4 = scmp.lt.s32.totalorder %s415_s10, %s1911_s13 }
  0xa1   : > { %p1908_p3 = pnand %p1906_p6, %p2305_p1  ;;  %p1914_p0 = scmp.lt.s32.totalorder %s1912_s14, %s1905_s4 }
  0xa3   : > { %p1909_p5 = pneg %p1908_p3  ;;  %p1915_p8 = por %p1914_p0, %p1913_p4 }
  0xa5   : > { %p1916_p7 = pnand %p1915_p8, %p1909_p5 }
  0xa7   : > { %1919 = shalt.err (!%p1916_p7)
}
  0xa8   : > { %p2671_p13 = scmp.ne.s32.totalorder %s2665_s28, 0  ;;  %s2377_s11 = scalar_lea.hbm %s2615_s2, %s2281_s18 }
  0xa9   : > { %s443_s1 = scalar_lea.vmem [#allocation7], %s2278_s16  ;;  %s1920_s19 = scalar_lea.hbm %s2377_s11, 128 }
  0xaa   : > { %1685 = dma.hbm_to_vmem [thread:$0]  (!%p2671_p13), %s2351_s21, 128, %s415_s10, %s404_s17  }
  0xab   : > { %s450_s20 = sshll.u32 %s443_s1, 4  ;;  %p1921_p11 = scmp.ne.s32.totalorder %s2377_s11, %s1920_s19  ;;  %s451_s20 = int_to_ptr.vmem [resolvable:$true] %s450_s20 }
  0xac   : > { %s1925_s21 = scalar_lea.hbm %s2615_s2, 256  ;;  %p1926_p12 = scmp.lt.u32.totalorder %s2377_s11, %s2615_s2 }
  0xad   : > { %p1923_p10 = pnand %p1921_p11, %p2305_p1  ;;  %p1927_p2 = scmp.lt.u32.totalorder %s1925_s21, %s1920_s19 }
  0xae   : > { %p1929_p3 = scmp.lt.u32.totalorder %s1920_s19, %s2377_s11 }
  0xaf   : > { %p1924_p9 = pneg %p1923_p10  ;;  %p1928_p6 = por %p1927_p2, %p1926_p12 }
  0xb1   : > { %p1930_p5 = por %p1929_p3, %p1928_p6 }
  0xb3   : > { %p1931_p4 = pnand %p1930_p5, %p1924_p9 }
  0xb5   : > { %1934 = shalt.err (!%p1931_p4)
}
  0xb6   : > { %s1935_s13 = scalar_lea.vmem %s451_s20, 128  ;;  %s2071_s14 = smov [#allocation7]  }
  0xb7   : > { %p1936_p0 = scmp.ne.s32.totalorder %s451_s20, %s1935_s13  ;;  %s1940_s12 = sshll.u32 %s2071_s14, 4  ;;  %s1941_s12 = int_to_ptr.vmem [resolvable:$false] %s1940_s12 }
  0xb8   : > { %s1942_s26 = scalar_lea.vmem %s1941_s12, 256  ;;  %p1943_p11 = scmp.lt.s32.totalorder %s451_s20, %s1941_s12 }
  0xb9   : > { %p1938_p8 = pnand %p1936_p0, %p2305_p1  ;;  %p1944_p10 = scmp.lt.s32.totalorder %s1942_s26, %s1935_s13 }
  0xbb   : > { %p1939_p7 = pneg %p1938_p8  ;;  %p1945_p13 = por %p1944_p10, %p1943_p11 }
  0xbd   : > { %p1946_p2 = pnand %p1945_p13, %p1939_p7 }
  0xbf   : > { %1949 = shalt.err (!%p1946_p2)
}
  0xc0   : > { %p2672_p12 = scmp.ne.s32.totalorder %s2665_s28, 0  ;;  %s2402_s4 = scalar_lea.hbm %s2616_s3, %s2281_s18 }
  0xc1   : > { %s461_s30 = scalar_lea.vmem [#allocation8], %s2278_s16  ;;  %s2673_s10 = sand.u32 1, %s2062_s24  }
  0xc2   : > { %1691 = dma.hbm_to_vmem [thread:$0]  (!%p2672_p12), %s2377_s11, 128, %s451_s20, %s2299_s15  }
  0xc3   : > { %s468_s21 = sshll.u32 %s461_s30, 4  ;;  %s458_s17 = scalar_lea.sflag [#allocation9], %s2673_s10  ;;  %s469_s21 = int_to_ptr.vmem [resolvable:$true] %s468_s21 }
  0xc4   : > { %s1950_s13 = scalar_lea.hbm %s2402_s4, 128  ;;  %s1955_s20 = scalar_lea.hbm %s2616_s3, 256 }
  0xc5   : > { %p1951_p13 = scmp.ne.s32.totalorder %s2402_s4, %s1950_s13  ;;  %p1956_p3 = scmp.lt.u32.totalorder %s2402_s4, %s2616_s3 }
  0xc6   : > { %p1957_p5 = scmp.lt.u32.totalorder %s1955_s20, %s1950_s13  ;;  %p1959_p0 = scmp.lt.u32.totalorder %s1950_s13, %s2402_s4 }
  0xc7   : > { %p1953_p9 = pnand %p1951_p13, %p2305_p1 }
  0xc8   : > { %p1958_p4 = por %p1957_p5, %p1956_p3 }
  0xc9   : > { %p1954_p6 = pneg %p1953_p9 }
  0xca   : > { %p1960_p8 = por %p1959_p0, %p1958_p4 }
  0xcc   : > { %p1961_p7 = pnand %p1960_p8, %p1954_p6 }
  0xce   : > { %1964 = shalt.err (!%p1961_p7)
}
  0xcf   : > { %s1965_s16 = scalar_lea.vmem %s469_s21, 128  ;;  %s2072_s12 = smov [#allocation8]  }
  0xd0   : > { %p1966_p11 = scmp.ne.s32.totalorder %s469_s21, %s1965_s16  ;;  %s1970_s26 = sshll.u32 %s2072_s12, 4  ;;  %s1971_s26 = int_to_ptr.vmem [resolvable:$false] %s1970_s26 }
  0xd1   : > { %s1972_s1 = scalar_lea.vmem %s1971_s26, 256  ;;  %p1973_p13 = scmp.lt.s32.totalorder %s469_s21, %s1971_s26 }
  0xd2   : > { %p1968_p10 = pnand %p1966_p11, %p2305_p1  ;;  %p1974_p9 = scmp.lt.s32.totalorder %s1972_s1, %s1965_s16 }
  0xd4   : > { %p1969_p2 = pneg %p1968_p10  ;;  %p1975_p12 = por %p1974_p9, %p1973_p13 }
  0xd6   : > { %p1976_p3 = pnand %p1975_p12, %p1969_p2 }
  0xd8   : > { %1979 = shalt.err (!%p1976_p3)
}
  0xd9   : > { %p2674_p5 = scmp.ne.s32.totalorder %s2665_s28, 0  ;;  %p2675_p6 = scmp.ne.s32.totalorder %s2655_s29, 0 }
  0xda   : > { %s2427_s8 = sand.u32 (!%p2675_p6), 1, %s2054_s22   ;;  %p2676_p1 = scmp.ne.s32.totalorder (!%p2675_p6), %s2652_s27, 0 }
  0xdb   : > { %1694 = dma.hbm_to_vmem [thread:$0]  (!%p2674_p5), %s2402_s4, 128, %s469_s21, %s458_s17  }
  0xdc   : > { %477 = sbr.rel (%p2675_p6) target bundleno = 1695 (0x69f), region = 68  ;;  %s2430_s19 = sshll.u32 (!%p2675_p6), %s2427_s8, 3 }
  0xdd   : > { %s480_s30 = scalar_lea.sflag (!%p2675_p6), [#allocation3], %s2427_s8  ;;  %s483_s10 = scalar_lea.vmem (!%p2675_p6), [#allocation2], %s2430_s19 }
  0xe3   : > { %2025 = dma.done.wait (%p2676_p1), %s480_s30, 128  }
  0xe4   : > { %2027 = vsyncadd (%p2676_p1), %s480_s30, 4294967168  ;;  %s488_s29 = sand.u32 1, %s2168_s25   ;;  %s492_s4 = scalar_lea.vmem [#allocation5], %s2430_s19 }
  0xe5   : > { %s489_s28 = scalar_lea.sflag [#allocation6], %s488_s29 }
  0xe6   : > { %2029 = dma.done.wait (%p2676_p1), %s489_s28, 256  }
  0xe7   : > { %2031 = vsyncadd (%p2676_p1), %s489_s28, 4294967040  ;;  %s501_s21 = scalar_lea.vmem [#allocation7], %s2430_s19  ;;  %s507_s17 = scalar_lea.sflag [#allocation9], %s488_s29 }
  0xe8   : > { %s510_s13 = scalar_lea.vmem [#allocation8], %s2430_s19 }
  0xe9   : > { %2033 = dma.done.wait (%p2676_p1), %s507_s17, 128  }
  0xea   : > { %2035 = vsyncadd (%p2676_p1), %s507_s17, 4294967168  ;;  %p2677_p12 = scmp.eq.s32.totalorder %s2168_s25, 0 }
  0xec   : > { %2037 = dma.done.wait (%p2677_p12), [#allocation9], 256   ;;  %p2678_p4 = pmov %p2677_p12 }
  0xee   : > { %2039 = vsyncadd (%p2678_p4), [#allocation9], 4294967040  ;;  %p2679_p0 = pmov %p2678_p4 }
  0xf0   : > { %2041 = dma.done.wait (%p2679_p0), [#allocation12], 272   ;;  %p2680_p8 = pmov %p2679_p0 }
  0xf1   : > { %v2073_v0 = vmov 0.0   ;;  %vm2074_vm0 = vmmov 0   ;;  %v1752_v1 = vld [vmem:[%s2619_s6] sm:$0xff]   ;;  %v1754_v3 = vld [vmem:[%s2619_s6 + $0x8] sm:$0xff]   ;;  %v581_v5 = vld [vmem:[%s492_s4] sm:$0xff]  ;;  %vm608_vm1 = vcmask 261120  }
  0xf2   : > { %2043 = vsyncadd (%p2680_p8), [#allocation12], 4294967024  ;;  %1578 = vmatprep.subr.bf16.mxu1 %v2073_v0  ;;  %1570 = vmatprep.subr.bf16.mxu0 %v2073_v0  ;;  %v1753_v2 = vld [vmem:[#allocation10] sm:$0xff]   ;;  %v1755_v4 = vld [vmem:[#allocation10 + $0x8] sm:$0xff]   ;;  %v582_v7 = vpack.c.bf16 %v581_v5, %v581_v5  ;;  %vm789_vm2 = vcmask 64512   ;;  %s2075_s26 = smov 112  }
  0xf3   : > { %1582 = vmatprep.mubr.msk.bf16.mxu1 %vm2074_vm0, %v2073_v0  ;;  %1574 = vmatprep.mubr.msk.bf16.mxu0 %vm2074_vm0, %v2073_v0  ;;  %v579_v6 = vld [vmem:[%s483_s10] sm:$0xff]  ;;  %s2076_s1 = smov 120   ;;  %s2077_s30 = smov 104   ;;  %v1756_v25 = vld [vmem:[#allocation11] sm:$0xff]   ;;  %v1757_v26 = vld [vmem:[#allocation11 + $0x8] sm:$0xff]   ;;  %vm851_vm3 = vcmask 1043456  }
  0xf4   : > { %1579 = vmatpush3.bf16.msra.mxu1 %v1752_v1  ;;  %1571 = vmatpush3.bf16.msra.mxu0 %v1753_v2  ;;  %v580_v8 = vpack.c.bf16 %v579_v6, %v579_v6  ;;  %v1518_v9 = vld [vmem:[%s2620_s7] ss:$0 sm:$0xff]  ;;  %v788_v38 = vld [vmem:[%s510_s13] sm:$0xff]  ;;  %s2681_s28 = sld [smem:[#allocation29_spill]]  ;;  %s2078_s4 = smov 8   ;;  %vm1241_vm4 = vcmask 130048  }
  0xf5   : > { %1580 = vmatprep.subr.bf16.mxu1 %v2073_v0  ;;  %1572 = vmatprep.subr.bf16.mxu0 %v2073_v0  ;;  %v1514_v10 = vld [vmem:[%s2618_s5] ss:$0 sm:$0xff]  ;;  %s2079_s13 = smov 16   ;;  %s2080_s27 = smov 24   ;;  %vm1243_vm5 = vcmask 195584  }
  0xf6   : > { %v583_v27 = vld [vmem:[%s501_s21] sm:$0xff]  ;;  %s2682_s20 = sld [smem:[#allocation30_spill]]  ;;  %s2683_s18 = sld [smem:[#allocation24_spill]] }
  0xf7   : > { %v584_v28 = vpack.c.bf16 %v583_v27, %v583_v27  ;;  %v1522_v45 = vld [vmem:[#allocation13] ss:$0 sm:$0xff]  ;;  %s1539_s14 = sshll.u32 %s2168_s25, 7  ;;  %s577_s16 = scalar_lea.vmem [#allocation14], %s2430_s19 }
  0xf8   : > { %1581 = vmatpush3.bf16.msra.mxu1 %v1754_v3  ;;  %1573 = vmatpush3.bf16.msra.mxu0 %v1755_v4  ;;  %s1327_s12 = sshll.u32 %s577_s16, 4  ;;  %s1314_s25 = scalar_lea.sflag [#allocation4], %s2427_s8  ;;  %s2570_s12 = int_to_ptr.vmem [resolvable:$true] %s1327_s12 }
  0xf9   : > { %1594 = vmatprep.subr.bf16.mxu1 %v2073_v0  ;;  %1586 = vmatprep.subr.bf16.mxu0 %v2073_v0  ;;  %s1980_s19 = scalar_lea.vmem %s2570_s12, 128  ;;  %s2081_s29 = smov [#allocation14]  }
  0xfa   : > { %p1981_p7 = scmp.ne.s32.totalorder %s2570_s12, %s1980_s19 }
  0xfb   : > { %1583 = vmatmul.mubr.msk.bf16.vlgmr.msra.gmra.mrb[0].mxu1 %vm608_vm1, %v582_v7  ;;  %1575 = vmatmul.mubr.msk.bf16.vlgmr.msra.gmra.mrb[0].mxu0 %vm608_vm1, %v580_v8 }
  0xfc   : > { %1596 = vmatprep.mubr.msk.bf16.mxu1 %vm2074_vm0, %v2073_v0  ;;  %1590 = vmatprep.mubr.msk.bf16.mxu0 %vm2074_vm0, %v2073_v0  ;;  %p2685_p11 = scmp.ne.s32.totalorder %s2683_s18, 0 }
  0xfd   : > { %1587 = vmatpush3.bf16.msra.mxu0 %v1756_v25 }
  0xfe   : > { %1588 = vmatprep.subr.bf16.mxu0 %v2073_v0  ;;  %p1982_p10 = pnand %p1981_p7, %p2685_p11 }
 0x100   : > { %p1983_p2 = pneg %p1982_p10 }
 0x101   : > { %1589 = vmatpush3.bf16.msra.mxu0 %v1757_v26 }
 0x102   : > { %1600 = vmatprep.subr.bf16.mxu0 %v2073_v0 }
 0x104   : > { %1591 = vmatmul.mubr.msk.bf16.vlgmr.msra.gmra.mrb[4].mxu0 %vm608_vm1, %v584_v28 }
 0x105   : > { %1602 = vmatprep.mubr.msk.bf16.mxu0 %vm2074_vm0, %v2073_v0 }
 0x1ce   : > { %v712_v11 = vpop.f32.mrb[0].mxu1  ;;  %v646_v14 = vpop.f32.mrb[0].mxu0 }
 0x1cf   : > { %v713_v12 = vadd.f32 %v1518_v9, %v712_v11  ;;  %v1584_v13 = vpop.f32.mrb[1].mxu1  ;;  %v647_v15 = vadd.f32 %v1514_v10, %v646_v14  ;;  %v1576_v17 = vpop.f32.mrb[1].mxu0 }
 0x1d0   : > { %v715_v16 = vpop.f32.mrb[2].mxu1  ;;  %v649_v20 = vpop.f32.mrb[2].mxu0 }
 0x1d1   : > { %v786_v18 = vpack.c.bf16 %v713_v12, %v713_v12  ;;  %v1585_v19 = vpop.f32.mrb[3].mxu1  ;;  %v784_v21 = vmul.f32 0.35355338, %v647_v15  ;;  %v1577_v22 = vpop.f32.mrb[3].mxu0 }
 0x1d3   : > { %1010 = vrot.lane.b32.xlu1 %v786_v18, %s2075_s26  ;;  %899 = vrot.lane.b32.xlu0 %v786_v18, %s2076_s1  ;;  %v794_v23 = vsel %vm789_vm2, %v786_v18, 0  ;;  %v785_v24 = vpack.c.bf16 %v784_v21, %v784_v21 }
 0x1d4   : > { %1595 = vmatpush3.bf16.xpose.msra.mxu1 %v794_v23 }
 0x1d5   : > { %1606 = vmatprep.subr.bf16.mxu1 %v2073_v0 }
 0x1d7   : > { %1008 = vrot.lane.b32.xlu1 %v785_v24, %s2075_s26  ;;  %896 = vrot.lane.b32.xlu0 %v785_v24, %s2076_s1  ;;  %v778_v46 = vpop.f32.mrb[4].mxu0 }
 0x1d8   : > { %v779_v47 = vadd.f32 %v1522_v45, %v778_v46  ;;  %v1592_v48 = vpop.f32.mrb[5].mxu0 }
 0x1d9   : > { %v781_v49 = vpop.f32.mrb[6].mxu0 }
 0x1da   : > { %v787_v50 = vpack.c.bf16 %v779_v47, %v779_v47  ;;  %v1593_v51 = vpop.f32.mrb[7].mxu0 }
 0x1db   : > { %1118 = vrot.lane.b32.xlu1 %v785_v24, %s2077_s30  ;;  %1120 = vrot.lane.b32.xlu0 %v786_v18, %s2077_s30 }
 0x1dc   : > { %1597 = vmatmul.mubr.msk.bf16.vlgmr.msra.gmra.mrb[4].mxu1 %vm789_vm2, %v785_v24  ;;  %v853_v52 = vsel %vm851_vm3, %v787_v50, 0 }
 0x1dd   : > { %1608 = vmatprep.mubr.msk.bf16.mxu1 %vm2074_vm0, %v2073_v0  ;;  %1601 = vmatpush3.bf16.msra.mxu0 %v853_v52 }
 0x1de   : > { %1612 = vmatprep.subr.bf16.mxu0 %v2073_v0 }
 0x245   : > { %v900_v29 = vpop.permute.xlu0 %899  ;;  %v1011_v31 = vpop.permute.xlu1 %1010 }
 0x246   : > { %v905_v30 = vsel %vm789_vm2, %v900_v29, 0  ;;  %v1016_v33 = vsel %vm789_vm2, %v1011_v31, 0 }
 0x247   : > { %1607 = vmatpush3.bf16.xpose.msra.mxu1 %v905_v30 }
 0x248   : > { %1618 = vmatprep.subr.bf16.mxu1 %v2073_v0 }
 0x249   : > { %v897_v32 = vpop.permute.xlu0 %896  ;;  %v1009_v35 = vpop.permute.xlu1 %1008 }
 0x24d   : > { %v1121_v34 = vpop.permute.xlu0 %1120  ;;  %v1119_v37 = vpop.permute.xlu1 %1118 }
 0x24e   : > { %1609 = vmatmul.mubr.msk.bf16.vlgmr.msra.gmra.mrb[8].mxu1 %vm789_vm2, %v897_v32  ;;  %v1126_v36 = vsel %vm789_vm2, %v1121_v34, 0 }
 0x24f   : > { %1619 = vmatpush3.bf16.xpose.msra.mxu1 %v1016_v33  ;;  %1620 = vmatprep.mubr.msk.bf16.mxu1 %vm2074_vm0, %v2073_v0 }
 0x250   : > { %1630 = vmatprep.subr.bf16.mxu1 %v2073_v0 }
 0x256   : > { %1621 = vmatmul.mubr.msk.bf16.vlgmr.msra.gmra.mrb[12].mxu1 %vm789_vm2, %v1009_v35 }
 0x257   : > { %1631 = vmatpush3.bf16.xpose.msra.mxu1 %v1126_v36  ;;  %1632 = vmatprep.mubr.msk.bf16.mxu1 %vm2074_vm0, %v2073_v0 }
 0x258   : > { %1642 = vmatprep.subr.bf16.mxu1 %v2073_v0 }
 0x25e   : > { %1633 = vmatmul.mubr.msk.bf16.vlgmr.msra.gmra.mrb[16].mxu1 %vm789_vm2, %v1119_v37 }
 0x25f   : > { %1646 = vmatprep.mubr.msk.bf16.mxu1 %vm2074_vm0, %v2073_v0 }
 0x2af   : > { %v830_v39 = vpop.f32.mrb[4].mxu1 }
 0x2b0   : > { %v831_v40 = vadd.f32 %v830_v39, %v788_v38  ;;  %v1598_v41 = vpop.f32.mrb[5].mxu1 }
 0x2b1   : > { %v833_v42 = vpop.f32.mrb[6].mxu1 }
 0x2b2   : > { %v1599_v43 = vpop.f32.mrb[7].mxu1  ;;  %v836_v44 = vsel %vm789_vm2, %v831_v40, -inf }
 0x2b3   : > { %837 = vmax.xlane.f32.xlu0 %v836_v44 }
 0x321   : > { %v941_v53 = vpop.f32.mrb[8].mxu1 }
 0x322   : > { %v942_v54 = vadd.f32 %v941_v53, %v788_v38  ;;  %v1610_v55 = vpop.f32.mrb[9].mxu1 }
 0x323   : > { %v944_v56 = vpop.f32.mrb[10].mxu1 }
 0x324   : > { %v1611_v57 = vpop.f32.mrb[11].mxu1  ;;  %v947_v58 = vsel %vm789_vm2, %v942_v54, -inf }
 0x325   : > { %948 = vmax.xlane.f32.xlu1 %v947_v58 }
 0x329   : > { %v1052_v59 = vpop.f32.mrb[12].mxu1 }
 0x32a   : > { %v1053_v60 = vadd.f32 %v1052_v59, %v788_v38  ;;  %v1622_v61 = vpop.f32.mrb[13].mxu1  ;;  %v1759_v59 = vld [vmem:[%s2681_s28 + $0x8] sm:$0xff]  }
 0x32b   : > { %v1055_v62 = vpop.f32.mrb[14].mxu1 }
 0x32c   : > { %v1623_v63 = vpop.f32.mrb[15].mxu1  ;;  %v1058_v1 = vsel %vm789_vm2, %v1053_v60, -inf }
 0x32d   : > { %1059 = vmax.xlane.f32.xlu0 %v1058_v1 }
 0x331   : > { %v1162_v2 = vpop.f32.mrb[16].mxu1 }
 0x332   : > { %v1163_v3 = vadd.f32 %v1162_v2, %v788_v38  ;;  %v1634_v4 = vpop.f32.mrb[17].mxu1 }
 0x333   : > { %v1165_v5 = vpop.f32.mrb[18].mxu1 }
 0x334   : > { %v1635_v6 = vpop.f32.mrb[19].mxu1  ;;  %v1168_v7 = vsel %vm789_vm2, %v1163_v3, -inf }
 0x335   : > { %1169 = vmax.xlane.f32.xlu0 %v1168_v7 }
 0x340   : > { %v838_v8 = vpop.xlane.xlu0 %837 }
 0x341   : > { %v839_v9 = vsub.f32 %v831_v40, %v838_v8 }
 0x343   : > { %v840_v10 = vmul.f32 1.442695, %v839_v9 }
 0x345   : > { %1760 = vpow2.f32 %v840_v10 }
 0x34f   : > { %v1761_v11 = vpop.eup %1760 }
 0x350   : > { %v842_v12 = vsel %vm789_vm2, %v1761_v11, 0.0 }
 0x351   : > { %843 = vadd.xlane.f32.xlu1 %v842_v12 }
 0x362   : > { %960 = vrot.lane.b32.xlu1 %v787_v50, %s2076_s1 }
 0x3b2   : > { %v949_v13 = vpop.xlane.xlu1 %948 }
 0x3b3   : > { %v950_v14 = vsub.f32 %v942_v54, %v949_v13  ;;  %v1758_v54 = vld [vmem:[%s2681_s28] sm:$0xff]  }
 0x3b4   : > { %1643 = vmatpush3.bf16.msra.mxu1 %v1758_v54 }
 0x3b5   : > { %v951_v15 = vmul.f32 1.442695, %v950_v14  ;;  %1644 = vmatprep.subr.bf16.mxu1 %v2073_v0 }
 0x3b7   : > { %1762 = vpow2.f32 %v951_v15 }
 0x3b8   : > { %1645 = vmatpush3.bf16.msra.mxu1 %v1759_v59 }
 0x3ba   : > { %v1060_v16 = vpop.xlane.xlu0 %1059 }
 0x3bb   : > { %v1061_v17 = vsub.f32 %v1053_v60, %v1060_v16 }
 0x3bd   : > { %v1062_v18 = vmul.f32 1.442695, %v1061_v17 }
 0x3bf   : > { %1764 = vpow2.f32 %v1062_v18 }
 0x3c1   : > { %v1763_v19 = vpop.eup %1762 }
 0x3c2   : > { %v1170_v20 = vpop.xlane.xlu0 %1169  ;;  %v953_v21 = vsel %vm789_vm2, %v1763_v19, 0.0 }
 0x3c3   : > { %v1171_v22 = vsub.f32 %v1163_v3, %v1170_v20  ;;  %954 = vadd.xlane.f32.xlu0 %v953_v21 }
 0x3c5   : > { %v1172_v23 = vmul.f32 1.442695, %v1171_v22 }
 0x3c7   : > { %1766 = vpow2.f32 %v1172_v23 }
 0x3c9   : > { %v1765_v24 = vpop.eup %1764 }
 0x3ca   : > { %v1064_v25 = vsel %vm789_vm2, %v1765_v24, 0.0 }
 0x3cb   : > { %1065 = vadd.xlane.f32.xlu1 %v1064_v25 }
 0x3d1   : > { %v1767_v26 = vpop.eup %1766 }
 0x3d2   : > { %v1174_v27 = vsel %vm789_vm2, %v1767_v26, 0.0 }
 0x3d3   : > { %1175 = vadd.xlane.f32.xlu0 %v1174_v27 }
 0x3dc   : > { %1180 = vrot.lane.b32.xlu1 %v787_v50, %s2077_s30  ;;  %s2684_s30 = sld [smem:[#allocation31_spill]] }
 0x3de   : > { %v844_v28 = vpop.xlane.xlu1 %843 }
 0x3df   : > { %1768 = vrcp.f32 %v844_v28 }
 0x3e2   : > { %v961_v30 = vpop.permute.xlu1 %960  ;;  %s2568_s10 = scalar_lea.hbm %s2684_s30, %s1539_s14 }
 0x3e3   : > { %v966_v33 = vsel %vm851_vm3, %v961_v30, 0 }
 0x3e9   : > { %v1769_v29 = vpop.eup %1768  ;;  %1070 = vrot.lane.b32.xlu0 %v787_v50, %s2075_s26 }
 0x3ea   : > { %v846_v31 = vmul.f32 %v1769_v29, %v1761_v11  ;;  %v1534_v11 = vld [vmem:[%s2682_s20] ss:$0 sm:$0xff] }
 0x3ec   : > { %v847_v32 = vpack.c.bf16 %v846_v31, %v846_v31 }
 0x3ee   : > { %1603 = vmatmul.mubr.msk.bf16.vlgmr.msra.gmra.mrb[8].mxu0 %vm789_vm2, %v847_v32 }
 0x3ef   : > { %1613 = vmatpush3.bf16.msra.mxu0 %v966_v33  ;;  %1614 = vmatprep.mubr.msk.bf16.mxu0 %vm2074_vm0, %v2073_v0 }
 0x3f0   : > { %1624 = vmatprep.subr.bf16.mxu0 %v2073_v0 }
 0x450   : > { %v955_v34 = vpop.xlane.xlu0 %954 }
 0x451   : > { %1770 = vrcp.f32 %v955_v34 }
 0x458   : > { %v1066_v35 = vpop.xlane.xlu1 %1065 }
 0x459   : > { %1772 = vrcp.f32 %v1066_v35 }
 0x45b   : > { %v1771_v36 = vpop.eup %1770 }
 0x45c   : > { %v957_v37 = vmul.f32 %v1771_v36, %v1763_v19  ;;  %v1181_v44 = vpop.permute.xlu1 %1180 }
 0x45d   : > { %v1186_v46 = vsel %vm851_vm3, %v1181_v44, 0 }
 0x45e   : > { %v958_v38 = vpack.c.bf16 %v957_v37, %v957_v37 }
 0x460   : > { %v1176_v39 = vpop.xlane.xlu0 %1175  ;;  %1615 = vmatmul.mubr.msk.bf16.vlgmr.msra.gmra.mrb[12].mxu0 %vm789_vm2, %v958_v38 }
 0x461   : > { %1774 = vrcp.f32 %v1176_v39  ;;  %1626 = vmatprep.mubr.msk.bf16.mxu0 %vm2074_vm0, %v2073_v0 }
 0x463   : > { %v1773_v40 = vpop.eup %1772 }
 0x464   : > { %v1068_v41 = vmul.f32 %v1773_v40, %v1765_v24  ;;  %v1071_v42 = vpop.permute.xlu0 %1070 }
 0x465   : > { %v1076_v43 = vsel %vm851_vm3, %v1071_v42, 0 }
 0x466   : > { %1625 = vmatpush3.bf16.msra.mxu0 %v1076_v43  ;;  %v1069_v45 = vpack.c.bf16 %v1068_v41, %v1068_v41 }
 0x467   : > { %1636 = vmatprep.subr.bf16.mxu0 %v2073_v0 }
 0x469   : > { %1627 = vmatmul.mubr.msk.bf16.vlgmr.msra.gmra.mrb[16].mxu0 %vm789_vm2, %v1069_v45 }
 0x46a   : > { %1637 = vmatpush3.bf16.msra.mxu0 %v1186_v46  ;;  %1638 = vmatprep.mubr.msk.bf16.mxu0 %vm2074_vm0, %v2073_v0 }
 0x46b   : > { %v1775_v47 = vpop.eup %1774 }
 0x46c   : > { %v1178_v48 = vmul.f32 %v1775_v47, %v1767_v26 }
 0x46e   : > { %v1179_v49 = vpack.c.bf16 %v1178_v48, %v1178_v48 }
 0x471   : > { %1639 = vmatmul.mubr.msk.bf16.vlgmr.msra.gmra.mrb[20].mxu0 %vm789_vm2, %v1179_v49 }
 0x4c1   : > { %v889_v50 = vpop.f32.mrb[8].mxu0 }
 0x4c2   : > { %v1604_v51 = vpop.f32.mrb[9].mxu0 }
 0x4c3   : > { %v892_v52 = vpop.f32.mrb[10].mxu0 }
 0x4c4   : > { %v1605_v53 = vpop.f32.mrb[11].mxu0 }
 0x533   : > { %v1002_v55 = vpop.f32.mrb[12].mxu0 }
 0x534   : > { %1229 = vrot.lane.b32.xlu1 %v1002_v55, %s2078_s4  ;;  %v1616_v56 = vpop.f32.mrb[13].mxu0  ;;  %s1984_s4 = sshll.u32 %s2081_s29, 4  ;;  %s1985_s4 = int_to_ptr.vmem [resolvable:$false] %s1984_s4 }
 0x535   : > { %v1005_v57 = vpop.f32.mrb[14].mxu0  ;;  %s1986_s21 = scalar_lea.vmem %s1985_s4, 256  ;;  %p1987_p13 = scmp.lt.s32.totalorder %s2570_s12, %s1985_s4 }
 0x536   : > { %v1617_v58 = vpop.f32.mrb[15].mxu0  ;;  %p1988_p9 = scmp.lt.s32.totalorder %s1986_s21, %s1980_s19 }
 0x538   : > { %p1989_p3 = por %p1988_p9, %p1987_p13 }
 0x53a   : > { %p1990_p5 = pnand %p1989_p3, %p1983_p2 }
 0x53c   : > { %v1112_v60 = vpop.f32.mrb[16].mxu0 }
 0x53d   : > { %1233 = vrot.lane.b32.xlu0 %v1112_v60, %s2079_s13  ;;  %v1628_v61 = vpop.f32.mrb[17].mxu0 }
 0x53e   : > { %v1115_v62 = vpop.f32.mrb[18].mxu0 }
 0x53f   : > { %v1629_v63 = vpop.f32.mrb[19].mxu0 }
 0x544   : > { %v1222_v1 = vpop.f32.mrb[20].mxu0 }
 0x545   : > { %1237 = vrot.lane.b32.xlu1 %v1222_v1, %s2080_s27  ;;  %v1640_v0 = vpop.f32.mrb[21].mxu0 }
 0x546   : > { %v1225_v2 = vpop.f32.mrb[22].mxu0 }
 0x547   : > { %v1641_v3 = vpop.f32.mrb[23].mxu0 }
 0x5a6   : > { %v1230_v4 = vpop.permute.xlu1 %1229 }
 0x5a7   : > { %v1240_v6 = vsel %vm789_vm2, %v889_v50, %v1230_v4 }
 0x5af   : > { %v1234_v5 = vpop.permute.xlu0 %1233 }
 0x5b0   : > { %v1242_v7 = vsel %vm1241_vm4, %v1240_v6, %v1234_v5 }
 0x5b7   : > { %v1238_v8 = vpop.permute.xlu1 %1237 }
 0x5b8   : > { %v1244_v9 = vsel %vm1243_vm5, %v1242_v7, %v1238_v8 }
 0x5b9   : > { %v1245_v10 = vpack.c.bf16 %v1244_v9, %v1244_v9 }
 0x5bb   : > { %1647 = vmatmul.mubr.msk.bf16.vlgmr.msra.gmra.mrb[20].mxu1 %vm608_vm1, %v1245_v10 }
 0x68e   : > { %v1306_v12 = vpop.f32.mrb[20].mxu1 }
 0x68f   : > { %v1307_v13 = vadd.f32 %v1534_v11, %v1306_v12  ;;  %v1648_v14 = vpop.f32.mrb[21].mxu1 }
 0x690   : > { %v1309_v15 = vpop.f32.mrb[22].mxu1 }
 0x691   : > { %v1649_v16 = vpop.f32.mrb[23].mxu1  ;;  %1312 = vst.msk [vmem:[%s577_s16] sm:$0xff] %vm608_vm1, %v1307_v13 }
 0x692   : > { %1993 = shalt.err (!%p1990_p5)
}
 0x693   : > { %s1994_s8 = scalar_lea.hbm %s2568_s10, 128  ;;  %s1998_s27 = scalar_lea.hbm %s2684_s30, 256 }
 0x694   : > { %p1995_p6 = scmp.ne.s32.totalorder %s2568_s10, %s1994_s8  ;;  %p1999_p4 = scmp.lt.u32.totalorder %s2568_s10, %s2684_s30 }
 0x695   : > { %p2000_p0 = scmp.lt.u32.totalorder %s1998_s27, %s1994_s8  ;;  %p2002_p7 = scmp.lt.u32.totalorder %s1994_s8, %s2568_s10 }
 0x696   : > { %p1996_p1 = pnand %p1995_p6, %p2685_p11 }
 0x697   : > { %p2001_p8 = por %p2000_p0, %p1999_p4 }
 0x698   : > { %p1997_p12 = pneg %p1996_p1 }
 0x699   : > { %p2003_p10 = por %p2002_p7, %p2001_p8 }
 0x69b   : > { %p2004_p2 = pnand %p2003_p10, %p1997_p12 }
 0x69d   : > { %2007 = shalt.err (!%p2004_p2)
}
 0x69e   : > { %1670 = dma.vmem_to_hbm [thread:$0]  (%p2685_p11), %s2570_s12, 128, %s2568_s10, %s1314_s25  }
 0x69f PF: > { %s2686_s20 = sld [smem:[#allocation21_spill]]  ;;  %s2687_s14 = sld [smem:[#allocation22_spill]] }
 0x6a0   : > { %p2689_p9 = scmp.ge.s32.totalorder %s2062_s24, 2 }
 0x6a5   : > { %s1339_s16 = sand.u32 1, %s2686_s20   ;;  %p2688_p13 = scmp.ne.s32.totalorder %s2687_s14, 0 }
 0x6a6   : > { %s1340_s26 = scalar_lea.sflag [#allocation4], %s1339_s16 }
 0x6a7   : > { %p1696_p3 = pnand %p2689_p9, %p2688_p13 }
 0x6a9   : > { %2045 = dma.done.wait (!%p1696_p3), %s1340_s26, 128  }
 0x6aa   : > { %2047 = vsyncadd (!%p1696_p3), %s1340_s26, 4294967168  ;;  %s2690_s24 = sld [smem:[#allocation23_spill]]  ;;  %s2691_s1 = sld [smem:[#allocation25_spill]] }
 0x6ab   : > { %s2692_s21 = smov %s2054_s22  ;;  %s2693_s22 = smov %s2058_s23 }
 0x6b0   : > { %p32_p5 = scmp.ge.s32.totalorder %s2690_s24, 4   ;;  %s2694_s23 = smov %s2691_s1 }
 0x6b2   :  { %34 = sbr.rel (!%p32_p5) target bundleno = 17 (0x11), region = 162 }
 0x6b9   :  { %1345 = vsyncpa [#allocation3], 1 }
 0x6ba   :  { %1347 = vsyncpa [#allocation3 + $0x1], 1 }
 0x6bb   :  { %1348 = vsyncpa [#allocation6], 1 }
 0x6bc   :  { %1350 = vsyncpa [#allocation6 + $0x1], 1 }
 0x6bd   :  { %1351 = vsyncpa [#allocation9], 1 }
 0x6be   :  { %1353 = vsyncpa [#allocation9 + $0x1], 1 }
 0x6bf   :  { %1354 = vsyncpa [#allocation12], 1 }
 0x6c0   :  { %1355 = vsyncpa [#allocation4], 1 }
 0x6c1   :  { %1357 = vsyncpa [#allocation4 + $0x1], 1 }

</bundles_post_ra>
